<compile_context>
chip_gen: v5e
topology: v5e:2x2
jax: 0.10.0
libtpu: 0.0.40
codegen_flags: <defaults>
</compile_context>

<pallas_src>
import functools

import jax
import jax.numpy as jnp
from jax.experimental import pallas as pl
from jax.experimental.pallas import tpu as pltpu


_LANES = 128
_SUBLANES = 8
_TILE_1D = _SUBLANES * _LANES                # 1024: 1-D block granularity
_SMALL_BYPASS_ELEMS = 32 * 1024              # below this, plain XLA convert wins
_VMEM_BLOCK_BUDGET = 24 * 1024 * 1024        # double-buffered in+out bytes per step
_VMEM_LIMIT_BYTES = 32 * 1024 * 1024         # legal on v5e / v6e / v7x
_BUDGET_1D_ELEMS = 512 * 1024                # known-good footprint for 1-D blocks


def _cast_kernel(x_ref, o_ref):
    # Elementwise dtype conversion — the compute done by
    # CoordinateTranslator._ensure_tensor_properties on the tensor data.
    o_ref[...] = x_ref[...].astype(o_ref.dtype)


def _round_up(x, m):
    return ((x + m - 1) // m) * m


def _round_down(x, m):
    return (x // m) * m


def _compiler_params():
    return pltpu.CompilerParams(
        dimension_semantics=("parallel",),
        vmem_limit_bytes=_VMEM_LIMIT_BYTES,
    )


def _cost(total, in_dtype, out_dtype):
    # Pure-bandwidth op: no flops / transcendentals, one read + one write.
    return pl.CostEstimate(
        flops=0,
        transcendentals=0,
        bytes_accessed=total * (jnp.dtype(in_dtype).itemsize
                                + jnp.dtype(out_dtype).itemsize),
    )


def _cast_2d(flat, target_dtype):
    """Sublane/lane-dense path: total % 128 == 0 -> (rows, 128) view."""
    total = flat.shape[0]
    nrows = total // _LANES
    x2d = flat.reshape(nrows, _LANES)        # bitcast view, no extra HBM pass

    bytes_per_row = _LANES * (flat.dtype.itemsize
                              + jnp.dtype(target_dtype).itemsize)
    # VMEM budget for the double-buffered in+out blocks.
    budget_rows = max(_SUBLANES,
                      _round_down(_VMEM_BLOCK_BUDGET // (2 * bytes_per_row),
                                  _SUBLANES))
    # Cap at ~1/4 of the array so the grid has >= 3-4 steps (pipelining and
    # v7x megacore sharding); keep block_rows a multiple of 8.
    quarter_rows = max(_SUBLANES, _round_up(pl.cdiv(nrows, 4), _SUBLANES))
    block_rows = min(budget_rows, quarter_rows)
    grid = (pl.cdiv(nrows, block_rows),)

    out2d = pl.pallas_call(
        _cast_kernel,
        out_shape=jax.ShapeDtypeStruct((nrows, _LANES), target_dtype),
        grid=grid,
        in_specs=[pl.BlockSpec((block_rows, _LANES), lambda i: (i, 0))],
        out_specs=pl.BlockSpec((block_rows, _LANES), lambda i: (i, 0)),
        compiler_params=_compiler_params(),
        cost_estimate=_cost(total, flat.dtype, target_dtype),
    )(x2d)
    return out2d.reshape(total)


def _cast_1d(flat, target_dtype):
    """Fallback for ragged totals (total % 128 != 0): flat 1-D blocks with
    Pallas masking the ragged last block.  Keeps HBM traffic at exactly one
    read + one write (no pad / slice / concat round-trips)."""
    total = flat.shape[0]
    quarter = max(_TILE_1D, _round_up(pl.cdiv(total, 4), _TILE_1D))
    block = min(_BUDGET_1D_ELEMS, quarter)
    grid = (pl.cdiv(total, block),)

    return pl.pallas_call(
        _cast_kernel,
        out_shape=jax.ShapeDtypeStruct((total,), target_dtype),
        grid=grid,
        in_specs=[pl.BlockSpec((block,), lambda i: (i,))],
        out_specs=pl.BlockSpec((block,), lambda i: (i,)),
        compiler_params=_compiler_params(),
        cost_estimate=_cost(total, flat.dtype, target_dtype),
    )(flat)


@functools.partial(jax.jit, static_argnames=("target_dtype",))
def _cast_pallas(coords, target_dtype):
    # Under jit the flatten / un-flatten reshapes are bitcasts fused around
    # the Pallas custom call rather than separate dispatches.
    orig_shape = coords.shape
    flat = coords.reshape(-1)
    total = flat.shape[0]
    if total % _LANES == 0:
        out = _cast_2d(flat, target_dtype)
    else:
        out = _cast_1d(flat, target_dtype)
    return out.reshape(orig_shape)


def coordinate_translator_forward(coords, target_dtype=jnp.float32):
    """Pallas equivalent of CoordinateTranslator.forward for tensor inputs.

    Args:
      coords: (N, 3) array of Cartesian coordinates (any float dtype).
      target_dtype: module's self.dtype (default float32).

    Returns:
      Array with the same shape/values as `coords`, in `target_dtype`.
    """
    target_dtype = jnp.dtype(target_dtype)

    # Mirrors `if tensor.dtype != self.dtype` in _ensure_tensor_properties:
    # already the requested dtype -> nothing to do numerically.
    # (Device placement / requires_grad are bookkeeping with no JAX analogue.)
    if coords.dtype == target_dtype:
        return coords

    total = coords.size
    # Launch-overhead-bound sizes (typical 3N coordinate arrays are a few KB):
    # a single XLA convert is already at roofline; a Pallas call would only
    # add fixed dispatch + DMA cost.
    if total < _SMALL_BYPASS_ELEMS:
        return coords.astype(target_dtype)

    return _cast_pallas(coords, target_dtype=target_dtype)


if __name__ == "__main__":
    key = jax.random.PRNGKey(0)

    # Case 1: realistic small coordinate array (200 atoms) -> small-input
    # bypass (plain convert; a kernel launch here would be pure overhead).
    coords_small = (
        jax.random.normal(key, (200, 3), dtype=jnp.float32) * 10.0
    ).astype(jnp.bfloat16)
    out1 = jax.block_until_ready(coordinate_translator_forward(coords_small))
    assert out1.shape == (200, 3) and out1.dtype == jnp.float32
    assert bool(jnp.array_equal(out1, coords_small.astype(jnp.float32)))

    # Case 2: sublane/lane-dense 2-D kernel path (total % 128 == 0):
    # 16384 atoms * 3 = 49152 elems -> (384, 128) view, block (96, 128), grid 4.
    n2 = 16384
    coords2 = jax.random.normal(
        jax.random.PRNGKey(0), (n2, 3), dtype=jnp.float32
    ).astype(jnp.bfloat16)
    out2 = jax.block_until_ready(coordinate_translator_forward(coords2))
    ref2 = coords2.astype(jnp.float32)
    assert out2.shape == (n2, 3) and out2.dtype == jnp.float32
    assert bool(jnp.array_equal(out2, ref2))

    # Case 3: ragged total (total % 128 != 0) -> flat 1-D fallback with a
    # Pallas-masked ragged last block: 16001*3 = 48003 elems, block 12288, grid 4.
    n3 = 16001
    coords3 = jax.random.normal(
        jax.random.PRNGKey(0), (n3, 3), dtype=jnp.float32
    ).astype(jnp.bfloat16)
    out3 = jax.block_until_ready(coordinate_translator_forward(coords3))
    ref3 = coords3.astype(jnp.float32)
    assert out3.shape == (n3, 3) and out3.dtype == jnp.float32
    assert bool(jnp.array_equal(out3, ref3))

    # Case 4: same-dtype fast path — no kernel launch, input returned as-is
    # (matches torch `.to(dtype=...)` no-op semantics).
    coords4 = jax.random.normal(key, (64, 3), dtype=jnp.float32)
    out4 = coordinate_translator_forward(coords4, target_dtype=jnp.float32)
    assert out4 is coords4

    print("KERNEL_OK")
</pallas_src>

<mosaic_0001>
module attributes {stable_mosaic.version = 11 : i64} {
  func.func @_cast_kernel(%arg0: i32, %arg1: memref<96x128xbf16, #tpu.memory_space<vmem>>, %arg2: memref<96x128xf32, #tpu.memory_space<vmem>>) attributes {dimension_semantics = [#tpu.dimension_semantics<parallel>], iteration_bounds = array<i64: 4>, scalar_prefetch = 0 : i64, scratch_operands = 0 : i64, tpu.core_type = #tpu.core_type<tc>, window_params = [{transform_indices = @transform_0, window_bounds = array<i64: 96, 128>}, {transform_indices = @transform_1, window_bounds = array<i64: 96, 128>}]} {
    %c0 = arith.constant 0 : index
    %c0_0 = arith.constant 0 : index
    %0 = vector.load %arg1[%c0, %c0_0] : memref<96x128xbf16, #tpu.memory_space<vmem>>, vector<96x128xbf16>
    %1 = arith.extf %0 : vector<96x128xbf16> to vector<96x128xf32>
    %c0_1 = arith.constant 0 : index
    %c0_2 = arith.constant 0 : index
    %2 = vector.load %arg2[%c0_1, %c0_2] : memref<96x128xf32, #tpu.memory_space<vmem>>, vector<96x128xf32>
    tpu.vector_store %arg2[%c0_1, %c0_2], %1 {strides = array<i32>} : memref<96x128xf32, #tpu.memory_space<vmem>>, vector<96x128xf32>,
    return
  }
  func.func @transform_0(%arg0: i32) -> (i32, i32) {
    %c0_i32 = arith.constant 0 : i32
    %c0_i32_0 = arith.constant 0 : i32
    return %arg0, %c0_i32 : i32, i32
  }
  func.func @transform_1(%arg0: i32) -> (i32, i32) {
    %c0_i32 = arith.constant 0 : i32
    %c0_i32_0 = arith.constant 0 : i32
    return %arg0, %c0_i32 : i32, i32
  }
}

</mosaic_0001>

<bundles_post_ra>
// kernel: _cast_pallas.1
= control target key start
LH: loop header
LB: loop body
LE: loop exit
PB: predicated region body
PF: predicated region fallthrough
CT: control target
= control target key end

     0   :  { %s276_s6 = smov 0   ;;  %s293_s0 = inlined_call_operand.vmem [shape: bf16[384,128], index: 0, kind: input, shape index: {}]   ;;  %s294_s1 = inlined_call_operand.vmem [shape: f32[384,128], index: 1, kind: output, shape index: {}]  }
   0x1 LB: > { %s212_s7 = sadd.s32 4294967295, %s264_s6   ;;  %p216_p0 = scmp.ge.s32.totalorder %s264_s6, 1  ;;  %s264_s6 = sphi %s276_s6, %s11_s6  }
   0x2   : > { %p88_p1 = scmp.lt.s32.totalorder %s264_s6, 5 }
   0x4   : > { %p89_p2 = pnand %p216_p0, %p88_p1 }
   0x5   : > { %s108_s8 = smul.u32 (!%p89_p2), 12, %s212_s7 }
   0x6   : > { %92 = sbr.rel (%p89_p2) target bundleno = 29 (0x1d), region = 24 }
   0x7   : > { %p109_p3 = scmp.lt.s32.totalorder (!%p89_p2), %s108_s8, 47 }
   0xb   : > { %s296_s8 = smov (!%p109_p3, %s108_s8), 47 }
   0xc   : > { %s217_s9 = sshll.u32 %s296_s8, 2  ;;  %s218_s10 = sshll.u32 %s296_s8, 3 }
   0xd   : > { %s112_s13 = scalar_lea.vmem %s293_s0, %s217_s9  ;;  %s118_s16 = scalar_lea.vmem %s294_s1, %s218_s10 }
   0xe   : > { %v222_v0 = vld [vmem:[%s112_s13] sm:$0xff]   ;;  %v245_v1 = vld [vmem:[%s112_s13 + $0x8] sm:$0xff]   ;;  %v246_v2 = vld [vmem:[%s112_s13 + $0x10] sm:$0xff]  }
   0xf   : > { %v223_v3 = vunpack.c.l.bf16 %v222_v0  ;;  %v224_v4 = vunpack.c.h.bf16 %v222_v0  ;;  %v227_v5 = vunpack.c.l.bf16 %v245_v1  ;;  %v228_v6 = vunpack.c.h.bf16 %v245_v1  ;;  %v247_v7 = vld [vmem:[%s112_s13 + $0x18] sm:$0xff]   ;;  %v248_v10 = vld [vmem:[%s112_s13 + $0x20] sm:$0xff]   ;;  %v249_v13 = vld [vmem:[%s112_s13 + $0x28] sm:$0xff]  }
  0x10   : > { %v231_v8 = vunpack.c.l.bf16 %v246_v2  ;;  %v232_v9 = vunpack.c.h.bf16 %v246_v2  ;;  %v235_v11 = vunpack.c.l.bf16 %v247_v7  ;;  %v236_v12 = vunpack.c.h.bf16 %v247_v7 }
  0x11   : > { %144 = vst [vmem:[%s118_s16] sm:$0xff] %v223_v3  ;;  %v239_v14 = vunpack.c.l.bf16 %v248_v10  ;;  %v240_v15 = vunpack.c.h.bf16 %v248_v10  ;;  %v243_v16 = vunpack.c.l.bf16 %v249_v13  ;;  %v244_v17 = vunpack.c.h.bf16 %v249_v13 }
  0x12   : > { %145 = vst [vmem:[%s118_s16 + $0x8] sm:$0xff] %v224_v4 }
  0x13   : > { %146 = vst [vmem:[%s118_s16 + $0x10] sm:$0xff] %v227_v5 }
  0x14   : > { %147 = vst [vmem:[%s118_s16 + $0x18] sm:$0xff] %v228_v6 }
  0x15   : > { %148 = vst [vmem:[%s118_s16 + $0x20] sm:$0xff] %v231_v8 }
  0x16   : > { %149 = vst [vmem:[%s118_s16 + $0x28] sm:$0xff] %v232_v9 }
  0x17   : > { %150 = vst [vmem:[%s118_s16 + $0x30] sm:$0xff] %v235_v11 }
  0x18   : > { %151 = vst [vmem:[%s118_s16 + $0x38] sm:$0xff] %v236_v12 }
  0x19   : > { %152 = vst [vmem:[%s118_s16 + $0x40] sm:$0xff] %v239_v14 }
  0x1a   : > { %153 = vst [vmem:[%s118_s16 + $0x48] sm:$0xff] %v240_v15 }
  0x1b   : > { %154 = vst [vmem:[%s118_s16 + $0x50] sm:$0xff] %v243_v16 }
  0x1c   : > { %155 = vst [vmem:[%s118_s16 + $0x58] sm:$0xff] %v244_v17 }
  0x1d PF: > { %s11_s6 = sadd.s32 1, %s264_s6  }
  0x1e   : > { %p8_p4 = scmp.ge.s32.totalorder %s11_s6, 6  }
  0x20   :  { %10 = sbr.rel (!%p8_p4) target bundleno = 1 (0x1), region = 54 }

</bundles_post_ra>
